<compile_context>
chip_gen: v7x
topology: tpu7x:2x2x1
jax: 0.10.0
libtpu: 0.0.40
codegen_flags: <defaults>
</compile_context>

<pallas_src>
import functools

import jax
import jax.numpy as jnp
from jax.experimental import pallas as pl
from jax.experimental.pallas import tpu as pltpu


def gem_kernel(p_ref, x_ref, o_ref, *, eps, inv_hw):
    # p_ref : SMEM (1,) learnable exponent p.
    # x_ref : (row_block, HW) VMEM tile (rows = (n, c) pairs, lanes = spatial).
    # o_ref : (1, row_block) VMEM tile -- lane-dense per-row results.
    p = p_ref[0]
    inv_p = 1.0 / p                                   # hoisted: one scalar op / step

    x = jnp.maximum(x_ref[...].astype(jnp.float32), eps)    # VALU (free under EUP)
    xp = jnp.exp(p * jnp.log(x))                             # x**p: 2 EUP ops/element

    # Row-sum on the (otherwise idle) MXU: ones(1, HW) contracted with xp's
    # lane axis -> (1, row_block).  Per-row sums land lane-dense, so no
    # sublane->lane relayout is needed and the store below is unmasked.
    ones = jnp.ones((1, x.shape[1]), dtype=jnp.float32)
    sums = jax.lax.dot_general(
        ones, xp,
        dimension_numbers=(((1,), (1,)), ((), ())),
        preferred_element_type=jnp.float32)                  # (1, row_block)

    mean = sums * inv_hw
    # mean > 0 (inputs clamped to eps); if it underflows to 0, log -> -inf and
    # exp -> 0, matching the reference pow() behaviour, so no extra guard.
    y = jnp.exp(jnp.log(mean) * inv_p)                       # mean ** (1/p)
    o_ref[...] = y.astype(o_ref.dtype)


def _pick_row_block(nc, hw, *, target_bytes=4 << 20, max_rows=2048):
    """Rows per tile: ~a few MiB of f32, multiple of 128, not far past NC."""
    rows = target_bytes // max(1, hw * 4)
    rows = max(128, min(max_rows, (rows // 128) * 128))
    rows = min(rows, pl.cdiv(nc, 128) * 128)   # don't over-pad tiny problems
    return max(rows, 128)


def gem(x, p, *, eps=1e-6, row_block=None):
    """GeM pooling. x: (N, C, H, W) -> (N, C, 1, 1).  p: (1,) learnable."""
    N, C, H, W = x.shape
    NC, HW = N * C, H * W
    if row_block is None:
        row_block = _pick_row_block(NC, HW)

    num_blocks = pl.cdiv(NC, row_block)
    NC_pad = num_blocks * row_block

    x2 = x.reshape(NC, HW)
    if NC_pad != NC:
        # Rows are independent: pad with a benign positive constant and slice
        # the padded results away afterwards (no in-kernel masking needed).
        x2 = jnp.pad(x2, ((0, NC_pad - NC), (0, 0)), constant_values=1.0)

    itemsize = jnp.dtype(x.dtype).itemsize
    cost = pl.CostEstimate(
        flops=5 * NC * HW,                # max + mul + MAC per element (approx)
        transcendentals=2 * NC * HW,      # log + exp per element (EUP-bound)
        bytes_accessed=NC * HW * itemsize + NC * itemsize,
    )

    out = pl.pallas_call(
        functools.partial(gem_kernel, eps=eps, inv_hw=1.0 / HW),
        out_shape=jax.ShapeDtypeStruct((1, NC_pad), x.dtype),
        grid=(num_blocks,),
        in_specs=[
            pl.BlockSpec(memory_space=pltpu.SMEM),             # p (scalar)
            pl.BlockSpec((row_block, HW), lambda i: (i, 0)),    # x rows
        ],
        out_specs=pl.BlockSpec((1, row_block), lambda i: (0, i)),  # lane-dense
        compiler_params=pltpu.CompilerParams(
            dimension_semantics=("parallel",),   # rows independent; shards TCs
            vmem_limit_bytes=32 * 1024 * 1024,   # headroom for few-MiB tiles
        ),
        cost_estimate=cost,
    )(p, x2)

    return out[0, :NC].reshape(N, C, 1, 1)


def gem_ref(x, p, eps=1e-6):
    """Pure-JAX reference matching the PyTorch forward."""
    xp = jnp.maximum(x, eps) ** p[0]
    pooled = jnp.mean(xp, axis=(-2, -1), keepdims=True)
    return pooled ** (1.0 / p[0])


if __name__ == "__main__":
    key = jax.random.PRNGKey(0)
    N, C, H, W = 2, 4, 16, 16
    x = jax.random.normal(key, (N, C, H, W), dtype=jnp.float32)

    # Parameter init identical to nn.Parameter(torch.ones(1) * 3).
    p = jnp.ones((1,), dtype=jnp.float32) * 3.0
    eps = 1e-6

    y = jax.block_until_ready(gem(x, p, eps=eps))
    y_ref = gem_ref(x, p, eps=eps)

    assert y.shape == (N, C, 1, 1), y.shape
    assert jnp.allclose(y, y_ref, rtol=2e-4, atol=1e-5), (
        f"max err {float(jnp.max(jnp.abs(y - y_ref)))}"
    )

    print("KERNEL_OK")
</pallas_src>

<mosaic_0001>
module attributes {stable_mosaic.version = 11 : i64} {
  func.func @gem_kernel(%arg0: i32, %arg1: memref<1xf32, #tpu.memory_space<smem>>, %arg2: memref<128x256xf32, #tpu.memory_space<vmem>>, %arg3: memref<1x128xf32, #tpu.memory_space<vmem>>) attributes {dimension_semantics = [#tpu.dimension_semantics<parallel>], iteration_bounds = array<i64: 1>, scalar_prefetch = 0 : i64, scratch_operands = 0 : i64, tpu.core_type = #tpu.core_type<tc>, window_params = [{transform_indices = @transform_0, window_bounds = array<i64: 1>}, {transform_indices = @transform_1, window_bounds = array<i64: 128, 256>}, {transform_indices = @transform_2, window_bounds = array<i64: 1, 128>}]} {
    %c0 = arith.constant 0 : index
    %0 = memref.load %arg1[%c0] : memref<1xf32, #tpu.memory_space<smem>>
    %cst = arith.constant 1.000000e+00 : f32
    %1 = arith.divf %cst, %0 : f32
    %c0_0 = arith.constant 0 : index
    %c0_1 = arith.constant 0 : index
    %2 = vector.load %arg2[%c0_0, %c0_1] : memref<128x256xf32, #tpu.memory_space<vmem>>, vector<128x256xf32>
    %cst_2 = arith.constant 9.99999997E-7 : f32
    %3 = vector.broadcast %cst_2 : f32 to vector<128x256xf32>
    %4 = arith.maximumf %2, %3 : vector<128x256xf32>
    %5 = math.log %4 : vector<128x256xf32>
    %6 = vector.broadcast %0 : f32 to vector<128x256xf32>
    %7 = arith.mulf %6, %5 : vector<128x256xf32>
    %8 = math.exp %7 : vector<128x256xf32>
    %cst_3 = arith.constant 1.000000e+00 : f32
    %9 = vector.broadcast %cst_3 : f32 to vector<1x256xf32>
    %cst_4 = arith.constant dense<0.000000e+00> : vector<1x128xf32>
    %10 = tpu.matmul %9, %8, %cst_4 {dimension_numbers = #tpu.dot_dimension_numbers<[1], [1], [0], [0], [0, 0, 1, 0], [], []>} : vector<1x256xf32>, vector<128x256xf32>, vector<1x128xf32> -> vector<1x128xf32>
    %cst_5 = arith.constant 3.906250e-03 : f32
    %11 = vector.broadcast %cst_5 : f32 to vector<1x128xf32>
    %12 = arith.mulf %10, %11 : vector<1x128xf32>
    %13 = math.log %12 : vector<1x128xf32>
    %14 = vector.broadcast %1 : f32 to vector<1x128xf32>
    %15 = arith.mulf %13, %14 : vector<1x128xf32>
    %16 = math.exp %15 : vector<1x128xf32>
    %c0_6 = arith.constant 0 : index
    %c0_7 = arith.constant 0 : index
    %17 = vector.load %arg3[%c0_6, %c0_7] : memref<1x128xf32, #tpu.memory_space<vmem>>, vector<1x128xf32>
    tpu.vector_store %arg3[%c0_6, %c0_7], %16 {strides = array<i32>} : memref<1x128xf32, #tpu.memory_space<vmem>>, vector<1x128xf32>,
    return
  }
  func.func @transform_0(%arg0: i32) -> i32 {
    %c0_i32 = arith.constant 0 : i32
    %c0_i32_0 = arith.constant 0 : i32
    return %c0_i32 : i32
  }
  func.func @transform_1(%arg0: i32) -> (i32, i32) {
    %c0_i32 = arith.constant 0 : i32
    %c0_i32_0 = arith.constant 0 : i32
    return %arg0, %c0_i32 : i32, i32
  }
  func.func @transform_2(%arg0: i32) -> (i32, i32) {
    %c0_i32 = arith.constant 0 : i32
    %c0_i32_0 = arith.constant 0 : i32
    return %c0_i32, %arg0 : i32, i32
  }
}

</mosaic_0001>

<bundles_post_ra>
// kernel: tpu_custom_call.1
= control target key start
LH: loop header
LB: loop body
LE: loop exit
PB: predicated region body
PF: predicated region fallthrough
CT: control target
= control target key end

     0   :  { %8 = vsyncpa [#allocation4], 0  ;;  %s663_s0 = inlined_call_operand.<no memory space> [shape: f32[1], index: 0, kind: input, shape index: {}]   ;;  %s664_s1 = inlined_call_operand.hbm [shape: f32[128,256], index: 1, kind: input, shape index: {}]   ;;  %s665_s2 = inlined_call_operand.hbm [shape: f32[1,128], index: 2, kind: output, shape index: {}]  }
   0x1   :  { %9 = vsyncpa [#allocation5], 0  ;;  %s570_s9 = smov [#allocation3]   ;;  %s522_s13 = scalar_lea.hbm %s664_s1, 4096 }
   0x2   :  { %s17_s10 = sshll.u32 %s570_s9, 4  ;;  %p523_p0 = scmp.ne.s32.totalorder %s664_s1, %s522_s13  ;;  %s18_s10 = int_to_ptr.vmem [resolvable:$true] %s17_s10 }
   0x3   :  { %p526_p1 = scmp.lt.u32.totalorder %s522_s13, %s664_s1 }
   0x5   :  { %p528_p2 = pnand %p526_p1, %p523_p0 }
   0x7   :  { %531 = shalt.err (!%p528_p2)
}
   0x8   :  { %s532_s18 = scalar_lea.vmem %s18_s10, 4096  ;;  %p537_p4 = scmp.lt.s32.totalorder %s18_s10, %s18_s10 }
   0x9   :  { %p533_p3 = scmp.ne.s32.totalorder %s18_s10, %s532_s18  ;;  %p538_p5 = scmp.lt.s32.totalorder %s532_s18, %s532_s18 }
   0xb   :  { %p539_p6 = por %p538_p5, %p537_p4 }
   0xd   :  { %p540_p7 = pnand %p539_p6, %p533_p3 }
   0xf   :  { %543 = shalt.err (!%p540_p7)
}
  0x10   :  { %s571_s19 = smov 256   ;;  %s572_s20 = smov 16  }
  0x11   :  { %23 = dma.hbm_to_vmem [thread:$0]  %s664_s1, 4096, %s18_s10, [#allocation4], %s571_s19, %s571_s19, %s572_s20  }
  0x12   :  { %566 = dma.done.wait [#allocation4], 4096  }
  0x13   :  { %567 = vsyncadd [#allocation4], 4294963200  ;;  %v605_v0 = vstv %s663_s0  ;;  %v573_v1 = vmov 1.0   ;;  %v32_v2 = vld [vmem:[#allocation3 + $0x8] sm:$0xff]  ;;  %v34_v3 = vld [vmem:[#allocation3 + $0x18] sm:$0xff]  ;;  %s574_s1 = smov [#allocation6]  }
  0x14   :  { %320 = vmatprep.mubr.f32.mxu0 %v573_v1  ;;  %388 = vrcp.f32 %v605_v0  ;;  %v31_v4 = vld [vmem:[#allocation3] sm:$0xff]  ;;  %v64_v5 = vmax.f32 %v32_v2, 1e-06  ;;  %v66_v6 = vmax.f32 %v34_v3, 1e-06  ;;  %v33_v7 = vld [vmem:[#allocation3 + $0x10] sm:$0xff] }
  0x15   :  { %v36_v8 = vld [vmem:[#allocation3 + $0x28] sm:$0xff]  ;;  %v63_v9 = vmax.f32 %v31_v4, 1e-06  ;;  %v65_v10 = vmax.f32 %v33_v7, 1e-06  ;;  %v38_v11 = vld [vmem:[#allocation3 + $0x38] sm:$0xff] }
  0x16   :  { %v35_v12 = vld [vmem:[#allocation3 + $0x20] sm:$0xff]  ;;  %390 = vlog2.f32 %v64_v5  ;;  %v68_v13 = vmax.f32 %v36_v8, 1e-06  ;;  %v37_v14 = vld [vmem:[#allocation3 + $0x30] sm:$0xff]  ;;  %v70_v16 = vmax.f32 %v38_v11, 1e-06 }
  0x17   :  { %392 = vlog2.f32 %v66_v6  ;;  %v40_v17 = vld [vmem:[#allocation3 + $0x48] sm:$0xff]  ;;  %v67_v18 = vmax.f32 %v35_v12, 1e-06  ;;  %v42_v19 = vld [vmem:[#allocation3 + $0x58] sm:$0xff]  ;;  %v69_v20 = vmax.f32 %v37_v14, 1e-06 }
  0x18   :  { %394 = vlog2.f32 %v63_v9  ;;  %v39_v21 = vld [vmem:[#allocation3 + $0x40] sm:$0xff]  ;;  %v72_v22 = vmax.f32 %v40_v17, 1e-06  ;;  %v41_v23 = vld [vmem:[#allocation3 + $0x50] sm:$0xff]  ;;  %v74_v24 = vmax.f32 %v42_v19, 1e-06 }
  0x19   :  { %396 = vlog2.f32 %v65_v10  ;;  %v44_v25 = vld [vmem:[#allocation3 + $0x68] sm:$0xff]  ;;  %v71_v26 = vmax.f32 %v39_v21, 1e-06  ;;  %v46_v27 = vld [vmem:[#allocation3 + $0x78] sm:$0xff]  ;;  %v73_v28 = vmax.f32 %v41_v23, 1e-06 }
  0x1a   :  { %398 = vlog2.f32 %v68_v13  ;;  %v43_v29 = vld [vmem:[#allocation3 + $0x60] sm:$0xff]  ;;  %v76_v30 = vmax.f32 %v44_v25, 1e-06  ;;  %v45_v31 = vld [vmem:[#allocation3 + $0x70] sm:$0xff]  ;;  %v78_v32 = vmax.f32 %v46_v27, 1e-06 }
  0x1b   :  { %400 = vlog2.f32 %v70_v16  ;;  %v48_v33 = vld [vmem:[#allocation3 + $0x88] sm:$0xff]  ;;  %v75_v35 = vmax.f32 %v43_v29, 1e-06  ;;  %v77_v38 = vmax.f32 %v45_v31, 1e-06  ;;  %s340_s25 = sshll.u32 %s574_s1, 4  ;;  %s341_s25 = int_to_ptr.vmem [resolvable:$true] %s340_s25 }
  0x1c   :  { %402 = vlog2.f32 %v67_v18  ;;  %v80_v41 = vmax.f32 %v48_v33, 1e-06  ;;  %s544_s26 = scalar_lea.vmem %s341_s25, 16  ;;  %s548_s27 = scalar_lea.vmem %s341_s25, 32 }
  0x1d   :  { %404 = vlog2.f32 %v69_v20  ;;  %p545_p8 = scmp.ne.s32.totalorder %s341_s25, %s544_s26  ;;  %p549_p9 = scmp.lt.s32.totalorder %s341_s25, %s341_s25 }
  0x1e   :  { %v389_v15 = vpop.eup %388  ;;  %406 = vlog2.f32 %v72_v22  ;;  %p550_p10 = scmp.lt.s32.totalorder %s548_s27, %s544_s26 }
  0x1f   :  { %381 = vpush %v389_v15  ;;  %408 = vlog2.f32 %v74_v24 }
  0x20   :  { %v391_v34 = vpop.eup %390  ;;  %410 = vlog2.f32 %v71_v26  ;;  %p551_p11 = por %p550_p10, %p549_p9 }
  0x21   :  { %v393_v36 = vpop.eup %392  ;;  %v98_v37 = vmul.f32 0.6931472, %v391_v34  ;;  %412 = vlog2.f32 %v73_v28 }
  0x22   :  { %v395_v39 = vpop.eup %394  ;;  %v102_v40 = vmul.f32 0.6931472, %v393_v36  ;;  %414 = vlog2.f32 %v76_v30  ;;  %v50_v30 = vld [vmem:[#allocation3 + $0x98] sm:$0xff]  ;;  %p552_p12 = pnand %p551_p11, %p545_p8 }
  0x23   :  { %v397_v42 = vpop.eup %396  ;;  %v161_v43 = vmul.f32 %v98_v37, %v605_v0  ;;  %v96_v44 = vmul.f32 0.6931472, %v395_v39  ;;  %416 = vlog2.f32 %v78_v32 }
  0x24   :  { %v399_v45 = vpop.eup %398  ;;  %v163_v46 = vmul.f32 %v102_v40, %v605_v0  ;;  %v100_v47 = vmul.f32 0.6931472, %v397_v42  ;;  %418 = vlog2.f32 %v75_v35  ;;  %v82_v42 = vmax.f32 %v50_v30, 1e-06 }
  0x25   :  { %v401_v48 = vpop.eup %400  ;;  %v194_v49 = vmul.f32 1.442695, %v161_v43  ;;  %v160_v50 = vmul.f32 %v96_v44, %v605_v0  ;;  %v106_v51 = vmul.f32 0.6931472, %v399_v45  ;;  %420 = vlog2.f32 %v77_v38  ;;  %v47_v43 = vld [vmem:[#allocation3 + $0x80] sm:$0xff] }
  0x26   :  { %v403_v52 = vpop.eup %402  ;;  %v198_v53 = vmul.f32 1.442695, %v163_v46  ;;  %v162_v54 = vmul.f32 %v100_v47, %v605_v0  ;;  %v110_v55 = vmul.f32 0.6931472, %v401_v48  ;;  %422 = vlog2.f32 %v80_v41  ;;  %v49_v48 = vld [vmem:[#allocation3 + $0x90] sm:$0xff] }
  0x27   :  { %v405_v56 = vpop.eup %404  ;;  %424 = vpow2.f32 %v194_v49  ;;  %v192_v57 = vmul.f32 1.442695, %v160_v50  ;;  %v165_v58 = vmul.f32 %v106_v51, %v605_v0  ;;  %v104_v59 = vmul.f32 0.6931472, %v403_v52  ;;  %v52_v51 = vld [vmem:[#allocation3 + $0xa8] sm:$0xff] }
  0x28   :  { %v407_v60 = vpop.eup %406  ;;  %426 = vpow2.f32 %v198_v53  ;;  %v196_v61 = vmul.f32 1.442695, %v162_v54  ;;  %v167_v62 = vmul.f32 %v110_v55, %v605_v0  ;;  %v108_v63 = vmul.f32 0.6931472, %v405_v56  ;;  %v54_v56 = vld [vmem:[#allocation3 + $0xb8] sm:$0xff] }
  0x29   :  { %v409_v2 = vpop.eup %408  ;;  %428 = vpow2.f32 %v192_v57  ;;  %v202_v3 = vmul.f32 1.442695, %v165_v58  ;;  %v164_v4 = vmul.f32 %v104_v59, %v605_v0  ;;  %v114_v5 = vmul.f32 0.6931472, %v407_v60  ;;  %v51_v59 = vld [vmem:[#allocation3 + $0xa0] sm:$0xff] }
  0x2a   :  { %v411_v6 = vpop.eup %410  ;;  %430 = vpow2.f32 %v196_v61  ;;  %v206_v7 = vmul.f32 1.442695, %v167_v62  ;;  %v166_v8 = vmul.f32 %v108_v63, %v605_v0  ;;  %v118_v9 = vmul.f32 0.6931472, %v409_v2  ;;  %v53_v63 = vld [vmem:[#allocation3 + $0xb0] sm:$0xff] }
  0x2b   :  { %v413_v10 = vpop.eup %412  ;;  %432 = vpow2.f32 %v202_v3  ;;  %v200_v11 = vmul.f32 1.442695, %v164_v4  ;;  %v169_v12 = vmul.f32 %v114_v5, %v605_v0  ;;  %v112_v13 = vmul.f32 0.6931472, %v411_v6  ;;  %v56_v4 = vld [vmem:[#allocation3 + $0xc8] sm:$0xff] }
  0x2c   :  { %v415_v14 = vpop.eup %414  ;;  %434 = vpow2.f32 %v206_v7  ;;  %v204_v15 = vmul.f32 1.442695, %v166_v8  ;;  %v171_v16 = vmul.f32 %v118_v9, %v605_v0  ;;  %v116_v17 = vmul.f32 0.6931472, %v413_v10  ;;  %v58_v7 = vld [vmem:[#allocation3 + $0xd8] sm:$0xff]  ;;  %v55_v10 = vld [vmem:[#allocation3 + $0xc0] sm:$0xff] }
  0x2d   :  { %v417_v18 = vpop.eup %416  ;;  %436 = vpow2.f32 %v200_v11  ;;  %v210_v19 = vmul.f32 1.442695, %v169_v12  ;;  %v168_v20 = vmul.f32 %v112_v13, %v605_v0  ;;  %v122_v21 = vmul.f32 0.6931472, %v415_v14  ;;  %v57_v14 = vld [vmem:[#allocation3 + $0xd0] sm:$0xff] }
  0x2e   :  { %v419_v22 = vpop.eup %418  ;;  %438 = vpow2.f32 %v204_v15  ;;  %v214_v23 = vmul.f32 1.442695, %v171_v16  ;;  %v170_v24 = vmul.f32 %v116_v17, %v605_v0  ;;  %v126_v25 = vmul.f32 0.6931472, %v417_v18  ;;  %v60_v18 = vld [vmem:[#allocation3 + $0xe8] sm:$0xff] }
  0x2f   :  { %v421_v26 = vpop.eup %420  ;;  %440 = vpow2.f32 %v210_v19  ;;  %v208_v27 = vmul.f32 1.442695, %v168_v20  ;;  %v173_v28 = vmul.f32 %v122_v21, %v605_v0  ;;  %v120_v29 = vmul.f32 0.6931472, %v419_v22  ;;  %v62_v21 = vld [vmem:[#allocation3 + $0xf8] sm:$0xff] }
  0x30   :  { %v423_v31 = vpop.eup %422  ;;  %442 = vpow2.f32 %v214_v23  ;;  %v212_v32 = vmul.f32 1.442695, %v170_v24  ;;  %v175_v33 = vmul.f32 %v126_v25, %v605_v0  ;;  %v124_v34 = vmul.f32 0.6931472, %v421_v26  ;;  %v59_v24 = vld [vmem:[#allocation3 + $0xe0] sm:$0xff] }
  0x31   :  { %v425_v35 = vpop.eup %424  ;;  %444 = vpow2.f32 %v208_v27  ;;  %v218_v36 = vmul.f32 1.442695, %v173_v28  ;;  %v172_v37 = vmul.f32 %v120_v29, %v605_v0  ;;  %v130_v38 = vmul.f32 0.6931472, %v423_v31  ;;  %v61_v27 = vld [vmem:[#allocation3 + $0xf0] sm:$0xff] }
  0x32   :  { %v427_v39 = vpop.eup %426  ;;  %446 = vpow2.f32 %v212_v32  ;;  %v222_v40 = vmul.f32 1.442695, %v175_v33  ;;  %v174_v41 = vmul.f32 %v124_v34, %v605_v0  ;;  %v79_v55 = vmax.f32 %v47_v43, 1e-06 }
  0x33   :  { %v429_v44 = vpop.eup %428  ;;  %v349_v45 = vpack.c.bf16 %v427_v39, %v425_v35  ;;  %448 = vpow2.f32 %v218_v36  ;;  %v216_v46 = vmul.f32 1.442695, %v172_v37  ;;  %v177_v47 = vmul.f32 %v130_v38, %v605_v0 }
  0x34   :  { %v431_v49 = vpop.eup %430  ;;  %450 = vpow2.f32 %v222_v40  ;;  %v220_v50 = vmul.f32 1.442695, %v174_v41  ;;  %v81_v58 = vmax.f32 %v49_v48, 1e-06  ;;  %v84_v62 = vmax.f32 %v52_v51, 1e-06 }
  0x35   :  { %v433_v52 = vpop.eup %432  ;;  %350 = vmatprep.subr.bf16.mxu0 %v349_v45  ;;  %v351_v53 = vpack.c.bf16 %v431_v49, %v429_v44  ;;  %452 = vpow2.f32 %v216_v46  ;;  %v226_v54 = vmul.f32 1.442695, %v177_v47  ;;  %v86_v3 = vmax.f32 %v54_v56, 1e-06 }
  0x36   :  { %v435_v57 = vpop.eup %434  ;;  %454 = vpow2.f32 %v220_v50  ;;  %v83_v6 = vmax.f32 %v51_v59, 1e-06  ;;  %v85_v9 = vmax.f32 %v53_v63, 1e-06  ;;  %v88_v13 = vmax.f32 %v56_v4, 1e-06 }
  0x37   :  { %v437_v60 = vpop.eup %436  ;;  %352 = vmatpush1.bf16.xpose.msra.mxu0 %v351_v53  ;;  %v353_v61 = vpack.c.bf16 %v435_v57, %v433_v52  ;;  %456 = vlog2.f32 %v82_v42  ;;  %v90_v17 = vmax.f32 %v58_v7, 1e-06  ;;  %v87_v20 = vmax.f32 %v55_v10, 1e-06 }
  0x38   :  { %v439_v2 = vpop.eup %438  ;;  %458 = vpow2.f32 %v226_v54  ;;  %v89_v23 = vmax.f32 %v57_v14, 1e-06  ;;  %v92_v26 = vmax.f32 %v60_v18, 1e-06  ;;  %v94_v29 = vmax.f32 %v62_v21, 1e-06 }
  0x39   :  { %v441_v5 = vpop.eup %440  ;;  %354 = vmatprep.subr.bf16.mxu0 %v353_v61  ;;  %460 = vlog2.f32 %v79_v55  ;;  %v355_v12 = vpack.c.bf16 %v439_v2, %v437_v60  ;;  %v91_v31 = vmax.f32 %v59_v24, 1e-06  ;;  %v93_v34 = vmax.f32 %v61_v27, 1e-06 }
  0x3a   :  { %v443_v8 = vpop.eup %442  ;;  %462 = vlog2.f32 %v81_v58 }
  0x3b   :  { %v445_v11 = vpop.eup %444  ;;  %464 = vlog2.f32 %v84_v62  ;;  %v357_v16 = vpack.c.bf16 %v443_v8, %v441_v5 }
  0x3c   :  { %v447_v15 = vpop.eup %446  ;;  %466 = vlog2.f32 %v86_v3 }
  0x3d   :  { %v449_v19 = vpop.eup %448  ;;  %468 = vlog2.f32 %v83_v6  ;;  %v359_v36 = vpack.c.bf16 %v447_v15, %v445_v11 }
  0x3e   :  { %v451_v22 = vpop.eup %450  ;;  %470 = vlog2.f32 %v85_v9 }
  0x3f   :  { %v626_v25 = vpop.eup %452  ;;  %356 = vmatpush1.bf16.xpose.msra.mxu0 %v355_v12  ;;  %472 = vlog2.f32 %v88_v13  ;;  %v361_v38 = vpack.c.bf16 %v451_v22, %v449_v19 }
  0x40   :  { %v628_v28 = vpop.eup %454  ;;  %358 = vmatprep.subr.bf16.mxu0 %v357_v16  ;;  %474 = vlog2.f32 %v90_v17 }
  0x41   :  { %v457_v30 = vpop.eup %456  ;;  %476 = vlog2.f32 %v87_v20  ;;  %v363_v55 = vpack.c.bf16 %v628_v28, %v626_v25 }
  0x42   :  { %v630_v32 = vpop.eup %458  ;;  %v134_v33 = vmul.f32 0.6931472, %v457_v30  ;;  %478 = vlog2.f32 %v89_v23 }
  0x43   :  { %v461_v35 = vpop.eup %460  ;;  %480 = vlog2.f32 %v92_v26 }
  0x44   :  { %v463_v37 = vpop.eup %462  ;;  %v179_v39 = vmul.f32 %v134_v33, %v605_v0  ;;  %v128_v40 = vmul.f32 0.6931472, %v461_v35  ;;  %482 = vlog2.f32 %v94_v29 }
  0x45   :  { %v465_v41 = vpop.eup %464  ;;  %v132_v42 = vmul.f32 0.6931472, %v463_v37  ;;  %484 = vlog2.f32 %v91_v31 }
  0x46   :  { %v467_v43 = vpop.eup %466  ;;  %v230_v44 = vmul.f32 1.442695, %v179_v39  ;;  %v176_v45 = vmul.f32 %v128_v40, %v605_v0  ;;  %v138_v46 = vmul.f32 0.6931472, %v465_v41  ;;  %486 = vlog2.f32 %v93_v34 }
  0x47   :  { %v469_v47 = vpop.eup %468  ;;  %360 = vmatpush1.bf16.xpose.msra.mxu0 %v359_v36  ;;  %v178_v48 = vmul.f32 %v132_v42, %v605_v0  ;;  %v142_v49 = vmul.f32 0.6931472, %v467_v43 }
  0x48   :  { %v471_v50 = vpop.eup %470  ;;  %362 = vmatprep.subr.bf16.mxu0 %v361_v38  ;;  %488 = vpow2.f32 %v230_v44  ;;  %v224_v51 = vmul.f32 1.442695, %v176_v45  ;;  %v181_v52 = vmul.f32 %v138_v46, %v605_v0  ;;  %v136_v53 = vmul.f32 0.6931472, %v469_v47 }
  0x49   :  { %v473_v54 = vpop.eup %472  ;;  %v228_v56 = vmul.f32 1.442695, %v178_v48  ;;  %v183_v57 = vmul.f32 %v142_v49, %v605_v0  ;;  %v140_v58 = vmul.f32 0.6931472, %v471_v50 }
  0x4a   :  { %v475_v59 = vpop.eup %474  ;;  %490 = vpow2.f32 %v224_v51  ;;  %v234_v60 = vmul.f32 1.442695, %v181_v52  ;;  %v180_v61 = vmul.f32 %v136_v53, %v605_v0  ;;  %v146_v62 = vmul.f32 0.6931472, %v473_v54 }
  0x4b   :  { %v477_v63 = vpop.eup %476  ;;  %492 = vpow2.f32 %v228_v56  ;;  %v238_v2 = vmul.f32 1.442695, %v183_v57  ;;  %v182_v3 = vmul.f32 %v140_v58, %v605_v0  ;;  %v150_v4 = vmul.f32 0.6931472, %v475_v59 }
  0x4c   :  { %v479_v5 = vpop.eup %478  ;;  %494 = vpow2.f32 %v234_v60  ;;  %v232_v6 = vmul.f32 1.442695, %v180_v61  ;;  %v185_v7 = vmul.f32 %v146_v62, %v605_v0  ;;  %v144_v8 = vmul.f32 0.6931472, %v477_v63 }
  0x4d   :  { %v481_v9 = vpop.eup %480  ;;  %496 = vpow2.f32 %v238_v2  ;;  %v236_v10 = vmul.f32 1.442695, %v182_v3  ;;  %v187_v11 = vmul.f32 %v150_v4, %v605_v0  ;;  %v148_v12 = vmul.f32 0.6931472, %v479_v5 }
  0x4e   :  { %v483_v13 = vpop.eup %482  ;;  %498 = vpow2.f32 %v232_v6  ;;  %v242_v14 = vmul.f32 1.442695, %v185_v7  ;;  %v184_v15 = vmul.f32 %v144_v8, %v605_v0  ;;  %v154_v16 = vmul.f32 0.6931472, %v481_v9 }
  0x4f   :  { %v485_v17 = vpop.eup %484  ;;  %364 = vmatpush1.bf16.xpose.msra.mxu0 %v363_v55  ;;  %500 = vpow2.f32 %v236_v10  ;;  %v246_v18 = vmul.f32 1.442695, %v187_v11  ;;  %v186_v19 = vmul.f32 %v148_v12, %v605_v0  ;;  %v158_v20 = vmul.f32 0.6931472, %v483_v13 }
  0x50   :  { %v487_v21 = vpop.eup %486  ;;  %502 = vpow2.f32 %v242_v14  ;;  %v189_v22 = vmul.f32 %v154_v16, %v605_v0  ;;  %v240_v23 = vmul.f32 1.442695, %v184_v15  ;;  %v152_v27 = vmul.f32 0.6931472, %v485_v17  ;;  %s382_s0 = spop %381 }
  0x51   :  { %504 = vpow2.f32 %v246_v18  ;;  %v191_v24 = vmul.f32 %v158_v20, %v605_v0  ;;  %v244_v26 = vmul.f32 1.442695, %v186_v19  ;;  %v156_v30 = vmul.f32 0.6931472, %v487_v21 }
  0x52   :  { %v489_v25 = vpop.eup %488  ;;  %v250_v29 = vmul.f32 1.442695, %v189_v22  ;;  %506 = vpow2.f32 %v240_v23  ;;  %v188_v37 = vmul.f32 %v152_v27, %v605_v0  ;;  %v329_v60 = vstv %s382_s0 }
  0x53   :  { %v365_v28 = vpack.c.bf16 %v489_v25, %v630_v32  ;;  %v254_v33 = vmul.f32 1.442695, %v191_v24  ;;  %508 = vpow2.f32 %v244_v26  ;;  %v190_v39 = vmul.f32 %v156_v30, %v605_v0 }
  0x54   :  { %v491_v31 = vpop.eup %490  ;;  %510 = vpow2.f32 %v250_v29  ;;  %v248_v43 = vmul.f32 1.442695, %v188_v37 }
  0x55   :  { %v493_v34 = vpop.eup %492  ;;  %366 = vmatprep.subr.bf16.mxu0 %v365_v28  ;;  %512 = vpow2.f32 %v254_v33  ;;  %v252_v45 = vmul.f32 1.442695, %v190_v39 }
  0x56   :  { %v495_v35 = vpop.eup %494  ;;  %v367_v36 = vpack.c.bf16 %v493_v34, %v491_v31  ;;  %514 = vpow2.f32 %v248_v43 }
  0x57   :  { %v497_v38 = vpop.eup %496  ;;  %516 = vpow2.f32 %v252_v45 }
  0x58   :  { %v499_v40 = vpop.eup %498  ;;  %368 = vmatpush1.bf16.xpose.msra.mxu0 %v367_v36  ;;  %v369_v41 = vpack.c.bf16 %v497_v38, %v495_v35 }
  0x59   :  { %v501_v32 = vpop.eup %500 }
  0x5a   :  { %v503_v42 = vpop.eup %502  ;;  %370 = vmatprep.subr.bf16.mxu0 %v369_v41  ;;  %v371_v46 = vpack.c.bf16 %v501_v32, %v499_v40 }
  0x5b   :  { %v505_v44 = vpop.eup %504 }
  0x5c   :  { %v373_v47 = vpack.c.bf16 %v505_v44, %v503_v42  ;;  %v507_v48 = vpop.eup %506 }
  0x5d   :  { %v509_v49 = vpop.eup %508 }
  0x5e   :  { %v511_v50 = vpop.eup %510  ;;  %v375_v51 = vpack.c.bf16 %v509_v49, %v507_v48 }
  0x5f   :  { %v513_v0 = vpop.eup %512 }
  0x60   :  { %372 = vmatpush1.bf16.xpose.msra.mxu0 %v371_v46  ;;  %v377_v52 = vpack.c.bf16 %v513_v0, %v511_v50  ;;  %v515_v53 = vpop.eup %514 }
  0x61   :  { %374 = vmatprep.subr.bf16.mxu0 %v373_v47  ;;  %v517_v54 = vpop.eup %516 }
  0x62   :  { %v379_v55 = vpack.c.bf16 %v517_v54, %v515_v53 }
  0x68   :  { %376 = vmatpush1.bf16.xpose.msra.mxu0 %v375_v51 }
  0x69   :  { %378 = vmatprep.subr.bf16.mxu0 %v377_v52 }
  0x70   :  { %380 = vmatpush1.bf16.xpose.msra.mxu0 %v379_v55 }
  0x77   :  { %321 = vmatmul.mubr.f32.vlgmr.msra.gmra.mrb[0].mxu0 %v573_v1 }
 0x14a   :  { %v322_v56 = vpop.f32.mrb[0].mxu0 }
 0x14b   :  { %v326_v57 = vmul.f32 0.00390625, %v322_v56  ;;  %v324_v58 = vpop.f32.mrb[1].mxu0 }
 0x14d   :  { %518 = vlog2.f32 %v326_v57 }
 0x157   :  { %v519_v59 = vpop.eup %518 }
 0x158   :  { %v328_v61 = vmul.f32 0.6931472, %v519_v59 }
 0x15a   :  { %v330_v62 = vmul.f32 %v329_v60, %v328_v61 }
 0x15c   :  { %v331_v63 = vmul.f32 1.442695, %v330_v62 }
 0x15e   :  { %520 = vpow2.f32 %v331_v63 }
 0x168   :  { %v521_v2 = vpop.eup %520 }
 0x169   :  { %333 = vst [vmem:[#allocation6] sm:$0x1] %v521_v2 }
 0x16a   :  { %555 = shalt.err (!%p552_p12)
}
 0x16b   :  { %s556_s30 = scalar_lea.hbm %s665_s2, 16 }
 0x16c   :  { %p557_p13 = scmp.ne.s32.totalorder %s665_s2, %s556_s30  ;;  %p560_p0 = scmp.lt.u32.totalorder %s556_s30, %s665_s2 }
 0x16e   :  { %p562_p1 = pnand %p560_p0, %p557_p13 }
 0x170   :  { %565 = shalt.err (!%p562_p1)
}
 0x171   :  { %343 = dma.vmem_to_hbm [thread:$0]  %s341_s25, 16, %s665_s2, [#allocation5]  }
 0x172   :  { %568 = dma.done.wait [#allocation5], 16  }
 0x173   :  { %569 = vsyncadd [#allocation5], 4294967280 }
 0x174   :  { %347 = vsyncpa [#allocation4], 1 }
 0x175   :  { %348 = vsyncpa [#allocation5], 1 }

</bundles_post_ra>
